<compile_context>
chip_gen: v7x
topology: tpu7x:2x2x1
jax: 0.10.0
libtpu: 0.0.40
codegen_flags: <defaults>
</compile_context>

<pallas_src>
import functools
import numpy as np
import jax
import jax.numpy as jnp
from jax.experimental import pallas as pl
from jax.experimental.pallas import tpu as pltpu

# Module parameter from __init__ (never used by the PyTorch forward — it
# hardcodes 100); kept only for parity.
LOGIT_SCALE = jnp.asarray(np.log(1.0 / 0.07), dtype=jnp.float32)

_LANE = 128
_EPS = 1e-30  # clamp for rsqrt on zero-padded rows


def _round_up(x, m):
    return ((x + m - 1) // m) * m


def _vmem_budget_bytes():
    """~75% of physical VMEM: ~48 MiB on v7x (64 MiB), ~96 MiB on v5e/v6e (128 MiB)."""
    phys = 64 * 1024 * 1024  # conservative fallback (v7x-sized)
    try:
        info = pltpu.get_tpu_info()
        phys = int(getattr(info, "vmem_capacity_bytes", phys) or phys)
    except Exception:
        pass
    return (phys * 3) // 4


@functools.lru_cache(maxsize=None)
def _single_buffer_supported():
    """Probe whether BlockSpec(pipeline_mode=pl.Buffered(1)) lowers on this install."""
    try:
        spec = pl.BlockSpec((8, 128), lambda i: (0, 0), pipeline_mode=pl.Buffered(1))

        def _probe(x_ref, o_ref):
            o_ref[...] = x_ref[...] + 1.0

        out = pl.pallas_call(
            _probe,
            out_shape=jax.ShapeDtypeStruct((8, 128), jnp.float32),
            grid=(1,),
            in_specs=[spec],
            out_specs=pl.BlockSpec((8, 128), lambda i: (0, 0)),
        )(jnp.zeros((8, 128), jnp.float32))
        jax.block_until_ready(out)
        return True
    except Exception:
        return False


def _resident_spec(block_shape, index_map):
    """Spec for an operand whose index_map is constant: double-buffering it only
    doubles VMEM for zero pipelining benefit, so single-buffer when supported."""
    if _single_buffer_supported():
        return pl.BlockSpec(block_shape, index_map, pipeline_mode=pl.Buffered(1))
    return pl.BlockSpec(block_shape, index_map)


def _pick_tile(rows_p, out_cols_p, dp, resident_bytes, budget):
    """Largest row tile whose per-pass VMEM footprint fits the budget.

    footprint ~ resident operand + 2*t*dp*4 (double-buffered input tile)
              + 2*t*cols*4 (double-buffered output tile) + ~2*t*cols*4 (logit/exp temps).
    Prefer tiles giving >= 2 grid steps so v7x's two TensorCores both get work.
    """
    def fits(t):
        return resident_bytes + 2 * t * dp * 4 + 4 * t * out_cols_p * 4 <= budget

    candidates = [t for t in (1024, 512, 256, 128) if rows_p % t == 0 and fits(t)]
    multi = [t for t in candidates if rows_p // t >= 2]
    if multi:
        return multi[0]
    if candidates:
        return candidates[0]
    # TODO(synk): for very large column counts even a 128-row tile overflows the
    # budget; add a second "arbitrary" grid axis over the columns with a
    # flash-style online-softmax (m/l/acc) accumulator instead of shrinking rows.
    return 128


def _softmax_rows(x):
    m = jnp.max(x, axis=1, keepdims=True)
    e = jnp.exp(x - m)
    s = jnp.sum(e, axis=1, keepdims=True)
    # approx reciprocal lowers to the EUP (vrcp) slot instead of VALU divides.
    return e * pl.reciprocal(s, approx=True)


def _mask_cols(x, valid):
    if valid < x.shape[1]:  # mask zero-padded columns before the softmax
        col = jax.lax.broadcasted_iota(jnp.int32, x.shape, 1)
        x = jnp.where(col < valid, x, -jnp.inf)
    return x


# ---------------------------------------------------------------------------
# Kernels
# ---------------------------------------------------------------------------

def _image_kernel(img_ref, txt_t_ref, probs_ref, *, m_valid):
    img = img_ref[...]                                          # (tn, Dp) f32
    sq = jnp.sum(img * img, axis=1, keepdims=True)
    # Fold the 100x logit scale into the per-row normalizer; clamp so padded
    # all-zero rows stay finite.
    img_n = img * (100.0 * jax.lax.rsqrt(jnp.maximum(sq, _EPS)))
    logits = jax.lax.dot_general(                               # (tn, Mp)
        img_n, txt_t_ref[...], (((1,), (0,)), ((), ())),
        preferred_element_type=jnp.float32)
    probs_ref[...] = _softmax_rows(_mask_cols(logits, m_valid)).astype(probs_ref.dtype)


def _text_kernel(txt_ref, img_t_ref, inv_ref, probs_ref, *, n_valid):
    logits_t = jax.lax.dot_general(                             # (tm, Np)
        txt_ref[...], img_t_ref[...], (((1,), (0,)), ((), ())),
        preferred_element_type=jnp.float32)
    logits_t = logits_t * inv_ref[...]                          # (1, Np): 100/||img|| column scale
    probs_ref[...] = _softmax_rows(_mask_cols(logits_t, n_valid)).astype(probs_ref.dtype)


def _fused_kernel(img_ref, txt_ref, probs_i_ref, probs_t_ref, *, n_valid, m_valid):
    img = img_ref[...]                                          # (Np, Dp)
    txt = txt_ref[...]                                          # (Mp, Dp)
    sq = jnp.sum(img * img, axis=1, keepdims=True)
    img_n = img * (100.0 * jax.lax.rsqrt(jnp.maximum(sq, _EPS)))
    logits_i = jax.lax.dot_general(                             # (Np, Mp)
        img_n, txt, (((1,), (1,)), ((), ())), preferred_element_type=jnp.float32)
    probs_i_ref[...] = _softmax_rows(_mask_cols(logits_i, m_valid)).astype(probs_i_ref.dtype)
    # Second MXU dot gives the transposed logits directly in (Mp, Np) layout.
    logits_t = jax.lax.dot_general(                             # (Mp, Np)
        txt, img_n, (((1,), (1,)), ((), ())), preferred_element_type=jnp.float32)
    probs_t_ref[...] = _softmax_rows(_mask_cols(logits_t, n_valid)).astype(probs_t_ref.dtype)


# ---------------------------------------------------------------------------
# Wrapper
# ---------------------------------------------------------------------------

def clip_decoder(image_features, text_features):
    """image_features: (N, D), text_features: (M, D) -> ((N, M), (M, N)) f32 probs."""
    N, D = image_features.shape
    M, Dt = text_features.shape
    assert D == Dt, "feature dims must match"

    Np, Mp, Dp = _round_up(N, _LANE), _round_up(M, _LANE), _round_up(D, _LANE)
    img_p = jnp.pad(image_features.astype(jnp.float32), ((0, Np - N), (0, Dp - D)))
    txt_p = jnp.pad(text_features.astype(jnp.float32), ((0, Mp - M), (0, Dp - D)))

    budget = _vmem_budget_bytes()

    def cparams(sem):
        return pltpu.CompilerParams(dimension_semantics=sem,
                                    vmem_limit_bytes=int(budget))

    # ---- Small-problem fast path: one fused call, single grid step. ----
    fused_bytes = 4 * (Np * Dp + Mp * Dp + 3 * Np * Mp + 3 * Mp * Np)
    if fused_bytes <= budget // 2:
        probs_img_p, probs_txt_p = pl.pallas_call(
            functools.partial(_fused_kernel, n_valid=N, m_valid=M),
            out_shape=(jax.ShapeDtypeStruct((Np, Mp), jnp.float32),
                       jax.ShapeDtypeStruct((Mp, Np), jnp.float32)),
            grid=(1,),
            in_specs=[_resident_spec((Np, Dp), lambda i: (0, 0)),
                      _resident_spec((Mp, Dp), lambda i: (0, 0))],
            out_specs=(pl.BlockSpec((Np, Mp), lambda i: (0, 0)),
                       pl.BlockSpec((Mp, Np), lambda i: (0, 0))),
            compiler_params=cparams(("arbitrary",)),
        )(img_p, txt_p)
        return probs_img_p[:N, :M], probs_txt_p[:M, :N]

    # ---- Large-problem path: two independent row-tiled passes. ----
    # Pre-transpose the resident RHS operands ONCE here (canonical (K, N) layout
    # for the MXU) instead of paying a per-grid-step relayout in the kernel.
    txt_t_p = txt_p.T                                   # (Dp, Mp)
    img_t_p = img_p.T                                   # (Dp, Np)
    # Per-image 100/||img|| column scale for pass B; depends only on the inputs,
    # so the two pallas_calls have no data dependency between them.
    inv_img = (100.0 * jax.lax.rsqrt(
        jnp.maximum(jnp.sum(img_p * img_p, axis=1), _EPS))).reshape(1, Np)

    tn = _pick_tile(Np, Mp, Dp, resident_bytes=Mp * Dp * 4, budget=budget)
    tm = _pick_tile(Mp, Np, Dp, resident_bytes=Np * Dp * 4, budget=budget)

    # Pass A: tile over image rows -> softmax(100 * img_n @ txt.T, dim=1).
    probs_img_p = pl.pallas_call(
        functools.partial(_image_kernel, m_valid=M),
        out_shape=jax.ShapeDtypeStruct((Np, Mp), jnp.float32),
        grid=(Np // tn,),
        in_specs=[pl.BlockSpec((tn, Dp), lambda i: (i, 0)),
                  _resident_spec((Dp, Mp), lambda i: (0, 0))],   # text resident
        out_specs=pl.BlockSpec((tn, Mp), lambda i: (i, 0)),
        compiler_params=cparams(("parallel",)),
    )(img_p, txt_t_p)

    # Pass B: tile over text rows -> transposed logits computed directly in
    # (M, N) layout from the raw image features + precomputed column scale.
    probs_txt_p = pl.pallas_call(
        functools.partial(_text_kernel, n_valid=N),
        out_shape=jax.ShapeDtypeStruct((Mp, Np), jnp.float32),
        grid=(Mp // tm,),
        in_specs=[pl.BlockSpec((tm, Dp), lambda j: (j, 0)),
                  _resident_spec((Dp, Np), lambda j: (0, 0)),    # images resident
                  _resident_spec((1, Np), lambda j: (0, 0))],    # 100/||img||
        out_specs=pl.BlockSpec((tm, Np), lambda j: (j, 0)),
        compiler_params=cparams(("parallel",)),
    )(txt_p, img_t_p, inv_img)

    return probs_img_p[:N, :M], probs_txt_p[:M, :N]


def clip_decoder_ref(image_features, text_features):
    """Pure-JAX reference mirroring the PyTorch forward."""
    img = image_features / jnp.linalg.norm(image_features, axis=1, keepdims=True)
    logits_per_image = 100.0 * img @ text_features.T
    logits_per_text = logits_per_image.T
    return (jax.nn.softmax(logits_per_image, axis=1),
            jax.nn.softmax(logits_per_text, axis=1))


if __name__ == "__main__":
    key = jax.random.PRNGKey(0)
    k1, k2 = jax.random.split(key)
    N, M, D = 8, 8, 32  # small shapes: 8 images, 8 texts, 32-dim embeddings
    image_features = jax.random.normal(k1, (N, D), dtype=jnp.float32)
    text_features = jax.random.normal(k2, (M, D), dtype=jnp.float32)

    probs_img, probs_txt = clip_decoder(image_features, text_features)
    jax.block_until_ready((probs_img, probs_txt))

    ref_img, ref_txt = clip_decoder_ref(image_features, text_features)
    # Slightly loosened vs f32-exact to cover pl.reciprocal(approx=True).
    np.testing.assert_allclose(np.asarray(probs_img), np.asarray(ref_img),
                               rtol=2e-3, atol=2e-4)
    np.testing.assert_allclose(np.asarray(probs_txt), np.asarray(ref_txt),
                               rtol=2e-3, atol=2e-4)

    print("KERNEL_OK")
</pallas_src>

<mosaic_0001>
module attributes {stable_mosaic.version = 11 : i64} {
  func.func @_probe(%arg0: i32, %arg1: memref<8x128xf32, #tpu.memory_space<vmem>>, %arg2: memref<8x128xf32, #tpu.memory_space<vmem>>) attributes {dimension_semantics = [#tpu.dimension_semantics<arbitrary>], iteration_bounds = array<i64: 1>, scalar_prefetch = 0 : i64, scratch_operands = 0 : i64, tpu.core_type = #tpu.core_type<tc>, window_params = [{pipeline_mode = #tpu.pipeline_mode<synchronous>, transform_indices = @transform_0, window_bounds = array<i64: 8, 128>}, {pipeline_mode = #tpu.pipeline_mode<synchronous>, transform_indices = @transform_1, window_bounds = array<i64: 8, 128>}]} {
    %c0 = arith.constant 0 : index
    %c0_0 = arith.constant 0 : index
    %0 = vector.load %arg1[%c0, %c0_0] : memref<8x128xf32, #tpu.memory_space<vmem>>, vector<8x128xf32>
    %cst = arith.constant 1.000000e+00 : f32
    %1 = vector.broadcast %cst : f32 to vector<8x128xf32>
    %2 = arith.addf %0, %1 : vector<8x128xf32>
    %c0_1 = arith.constant 0 : index
    %c0_2 = arith.constant 0 : index
    %3 = vector.load %arg2[%c0_1, %c0_2] : memref<8x128xf32, #tpu.memory_space<vmem>>, vector<8x128xf32>
    tpu.vector_store %arg2[%c0_1, %c0_2], %2 {strides = array<i32>} : memref<8x128xf32, #tpu.memory_space<vmem>>, vector<8x128xf32>,
    return
  }
  func.func @transform_0(%arg0: i32) -> (i32, i32) {
    %c0_i32 = arith.constant 0 : i32
    %c0_i32_0 = arith.constant 0 : i32
    %c0_i32_1 = arith.constant 0 : i32
    return %c0_i32, %c0_i32_0 : i32, i32
  }
  func.func @transform_1(%arg0: i32) -> (i32, i32) {
    %c0_i32 = arith.constant 0 : i32
    %c0_i32_0 = arith.constant 0 : i32
    %c0_i32_1 = arith.constant 0 : i32
    return %c0_i32, %c0_i32_0 : i32, i32
  }
}

module attributes {stable_mosaic.version = 11 : i64} {
  func.func @_fused_kernel(%arg0: i32, %arg1: memref<128x128xf32, #tpu.memory_space<vmem>>, %arg2: memref<128x128xf32, #tpu.memory_space<vmem>>, %arg3: memref<128x128xf32, #tpu.memory_space<vmem>>, %arg4: memref<128x128xf32, #tpu.memory_space<vmem>>) attributes {dimension_semantics = [#tpu.dimension_semantics<arbitrary>], iteration_bounds = array<i64: 1>, scalar_prefetch = 0 : i64, scratch_operands = 0 : i64, tpu.core_type = #tpu.core_type<tc>, window_params = [{pipeline_mode = #tpu.pipeline_mode<synchronous>, transform_indices = @transform_0, window_bounds = array<i64: 128, 128>}, {pipeline_mode = #tpu.pipeline_mode<synchronous>, transform_indices = @transform_1, window_bounds = array<i64: 128, 128>}, {pipeline_mode = #tpu.pipeline_mode<synchronous>, transform_indices = @transform_2, window_bounds = array<i64: 128, 128>}, {pipeline_mode = #tpu.pipeline_mode<synchronous>, transform_indices = @transform_3, window_bounds = array<i64: 128, 128>}]} {
    %c0 = arith.constant 0 : index
    %c0_0 = arith.constant 0 : index
    %0 = vector.load %arg1[%c0, %c0_0] : memref<128x128xf32, #tpu.memory_space<vmem>>, vector<128x128xf32>
    %c0_1 = arith.constant 0 : index
    %c0_2 = arith.constant 0 : index
    %1 = vector.load %arg2[%c0_1, %c0_2] : memref<128x128xf32, #tpu.memory_space<vmem>>, vector<128x128xf32>
    %2 = arith.mulf %0, %0 : vector<128x128xf32>
    %cst = arith.constant dense<0.000000e+00> : vector<128xf32>
    %3 = vector.multi_reduction <add>, %2, %cst [1] : vector<128x128xf32> to vector<128xf32>
    %4 = vector.shape_cast %3 : vector<128xf32> to vector<128x1xf32>
    %cst_3 = arith.constant 1.000000e-30 : f32
    %5 = vector.broadcast %cst_3 : f32 to vector<128x1xf32>
    %6 = arith.maximumf %4, %5 : vector<128x1xf32>
    %7 = math.rsqrt %6 : vector<128x1xf32>
    %cst_4 = arith.constant 1.000000e+02 : f32
    %8 = vector.broadcast %cst_4 : f32 to vector<128x1xf32>
    %9 = arith.mulf %8, %7 : vector<128x1xf32>
    %10 = vector.broadcast %9 : vector<128x1xf32> to vector<128x128xf32>
    %11 = arith.mulf %0, %10 : vector<128x128xf32>
    %cst_5 = arith.constant dense<0.000000e+00> : vector<128x128xf32>
    %12 = tpu.matmul %11, %1, %cst_5 {dimension_numbers = #tpu.dot_dimension_numbers<[1], [1], [0], [0], [0, 0, 1, 0], [], []>} : vector<128x128xf32>, vector<128x128xf32>, vector<128x128xf32> -> vector<128x128xf32>
    %13 = tpu.iota {dimensions = array<i32: 1>} : vector<128x128xi32>
    %c8_i32 = arith.constant 8 : i32
    %14 = vector.broadcast %c8_i32 : i32 to vector<128x128xi32>
    %15 = arith.cmpi slt, %13, %14 : vector<128x128xi32>
    %cst_6 = arith.constant 0xFF800000 : f32
    %16 = vector.broadcast %cst_6 : f32 to vector<128x128xf32>
    %17 = arith.select %15, %12, %16 : vector<128x128xi1>, vector<128x128xf32>
    %cst_7 = arith.constant dense<0xFF800000> : vector<128xf32>
    %18 = vector.multi_reduction <maximumf>, %17, %cst_7 [1] : vector<128x128xf32> to vector<128xf32>
    %19 = vector.shape_cast %18 : vector<128xf32> to vector<128x1xf32>
    %20 = vector.broadcast %19 : vector<128x1xf32> to vector<128x128xf32>
    %21 = arith.subf %17, %20 : vector<128x128xf32>
    %22 = math.exp %21 : vector<128x128xf32>
    %cst_8 = arith.constant dense<0.000000e+00> : vector<128xf32>
    %23 = vector.multi_reduction <add>, %22, %cst_8 [1] : vector<128x128xf32> to vector<128xf32>
    %24 = vector.shape_cast %23 : vector<128xf32> to vector<128x1xf32>
    %25 = tpu.reciprocal %24 {approx = true} : vector<128x1xf32> -> vector<128x1xf32>
    %26 = vector.broadcast %25 : vector<128x1xf32> to vector<128x128xf32>
    %27 = arith.mulf %22, %26 : vector<128x128xf32>
    %c0_9 = arith.constant 0 : index
    %c0_10 = arith.constant 0 : index
    %28 = vector.load %arg3[%c0_9, %c0_10] : memref<128x128xf32, #tpu.memory_space<vmem>>, vector<128x128xf32>
    tpu.vector_store %arg3[%c0_9, %c0_10], %27 {strides = array<i32>} : memref<128x128xf32, #tpu.memory_space<vmem>>, vector<128x128xf32>,
    %cst_11 = arith.constant dense<0.000000e+00> : vector<128x128xf32>
    %29 = tpu.matmul %1, %11, %cst_11 {dimension_numbers = #tpu.dot_dimension_numbers<[1], [1], [0], [0], [0, 0, 1, 0], [], []>} : vector<128x128xf32>, vector<128x128xf32>, vector<128x128xf32> -> vector<128x128xf32>
    %30 = tpu.iota {dimensions = array<i32: 1>} : vector<128x128xi32>
    %c8_i32_12 = arith.constant 8 : i32
    %31 = vector.broadcast %c8_i32_12 : i32 to vector<128x128xi32>
    %32 = arith.cmpi slt, %30, %31 : vector<128x128xi32>
    %cst_13 = arith.constant 0xFF800000 : f32
    %33 = vector.broadcast %cst_13 : f32 to vector<128x128xf32>
    %34 = arith.select %32, %29, %33 : vector<128x128xi1>, vector<128x128xf32>
    %cst_14 = arith.constant dense<0xFF800000> : vector<128xf32>
    %35 = vector.multi_reduction <maximumf>, %34, %cst_14 [1] : vector<128x128xf32> to vector<128xf32>
    %36 = vector.shape_cast %35 : vector<128xf32> to vector<128x1xf32>
    %37 = vector.broadcast %36 : vector<128x1xf32> to vector<128x128xf32>
    %38 = arith.subf %34, %37 : vector<128x128xf32>
    %39 = math.exp %38 : vector<128x128xf32>
    %cst_15 = arith.constant dense<0.000000e+00> : vector<128xf32>
    %40 = vector.multi_reduction <add>, %39, %cst_15 [1] : vector<128x128xf32> to vector<128xf32>
    %41 = vector.shape_cast %40 : vector<128xf32> to vector<128x1xf32>
    %42 = tpu.reciprocal %41 {approx = true} : vector<128x1xf32> -> vector<128x1xf32>
    %43 = vector.broadcast %42 : vector<128x1xf32> to vector<128x128xf32>
    %44 = arith.mulf %39, %43 : vector<128x128xf32>
    %c0_16 = arith.constant 0 : index
    %c0_17 = arith.constant 0 : index
    %45 = vector.load %arg4[%c0_16, %c0_17] : memref<128x128xf32, #tpu.memory_space<vmem>>, vector<128x128xf32>
    tpu.vector_store %arg4[%c0_16, %c0_17], %44 {strides = array<i32>} : memref<128x128xf32, #tpu.memory_space<vmem>>, vector<128x128xf32>,
    return
  }
  func.func @transform_0(%arg0: i32) -> (i32, i32) {
    %c0_i32 = arith.constant 0 : i32
    %c0_i32_0 = arith.constant 0 : i32
    %c0_i32_1 = arith.constant 0 : i32
    return %c0_i32, %c0_i32_0 : i32, i32
  }
  func.func @transform_1(%arg0: i32) -> (i32, i32) {
    %c0_i32 = arith.constant 0 : i32
    %c0_i32_0 = arith.constant 0 : i32
    %c0_i32_1 = arith.constant 0 : i32
    return %c0_i32, %c0_i32_0 : i32, i32
  }
  func.func @transform_2(%arg0: i32) -> (i32, i32) {
    %c0_i32 = arith.constant 0 : i32
    %c0_i32_0 = arith.constant 0 : i32
    %c0_i32_1 = arith.constant 0 : i32
    return %c0_i32, %c0_i32_0 : i32, i32
  }
  func.func @transform_3(%arg0: i32) -> (i32, i32) {
    %c0_i32 = arith.constant 0 : i32
    %c0_i32_0 = arith.constant 0 : i32
    %c0_i32_1 = arith.constant 0 : i32
    return %c0_i32, %c0_i32_0 : i32, i32
  }
}

</mosaic_0001>

<bundles_post_ra>
// kernel: tpu_custom_call.1
= control target key start
LH: loop header
LB: loop body
LE: loop exit
PB: predicated region body
PF: predicated region fallthrough
CT: control target
= control target key end

     0   :  { %6 = vsyncpa [#allocation3], 0  ;;  %s125_s0 = inlined_call_operand.hbm [shape: f32[8,128], index: 0, kind: input, shape index: {}]   ;;  %s126_s1 = inlined_call_operand.hbm [shape: f32[8,128], index: 1, kind: output, shape index: {}]  }
   0x1   :  { %7 = vsyncpa [#allocation4], 0  ;;  %s89_s6 = smov [#allocation2]   ;;  %s41_s10 = scalar_lea.hbm %s125_s0, 128 }
   0x2   :  { %s14_s7 = sshll.u32 %s89_s6, 4  ;;  %p42_p0 = scmp.ne.s32.totalorder %s125_s0, %s41_s10  ;;  %s15_s7 = int_to_ptr.vmem [resolvable:$true] %s14_s7 }
   0x3   :  { %p45_p1 = scmp.lt.u32.totalorder %s41_s10, %s125_s0 }
   0x5   :  { %p47_p2 = pnand %p45_p1, %p42_p0 }
   0x7   :  { %50 = shalt.err (!%p47_p2)
}
   0x8   :  { %s51_s15 = scalar_lea.vmem %s15_s7, 128  ;;  %p56_p4 = scmp.lt.s32.totalorder %s15_s7, %s15_s7 }
   0x9   :  { %p52_p3 = scmp.ne.s32.totalorder %s15_s7, %s51_s15  ;;  %p57_p5 = scmp.lt.s32.totalorder %s51_s15, %s51_s15 }
   0xb   :  { %p58_p6 = por %p57_p5, %p56_p4 }
   0xd   :  { %p59_p7 = pnand %p58_p6, %p52_p3 }
   0xf   :  { %62 = shalt.err (!%p59_p7)
}
  0x10   :  { %17 = dma.hbm_to_vmem [thread:$0]  %s125_s0, 128, %s15_s7, [#allocation3]  }
  0x11   :  { %85 = dma.done.wait [#allocation3], 128  }
  0x12   :  { %86 = vsyncadd [#allocation3], 4294967168  ;;  %s90_s18 = smov [#allocation5]   ;;  %v21_v0 = vld [vmem:[#allocation2] sm:$0xff] }
  0x13   :  { %s30_s19 = sshll.u32 %s90_s18, 4  ;;  %v22_v1 = vadd.f32 1.0, %v21_v0  ;;  %s31_s19 = int_to_ptr.vmem [resolvable:$true] %s30_s19 }
  0x14   :  { %s63_s20 = scalar_lea.vmem %s31_s19, 128  ;;  %p68_p9 = scmp.lt.s32.totalorder %s31_s19, %s31_s19 }
  0x15   :  { %23 = vst [vmem:[#allocation5] sm:$0xff] %v22_v1  ;;  %p64_p8 = scmp.ne.s32.totalorder %s31_s19, %s63_s20  ;;  %p69_p10 = scmp.lt.s32.totalorder %s63_s20, %s63_s20 }
  0x17   :  { %p70_p11 = por %p69_p10, %p68_p9 }
  0x19   :  { %p71_p12 = pnand %p70_p11, %p64_p8 }
  0x1b   :  { %74 = shalt.err (!%p71_p12)
}
  0x1c   :  { %s75_s23 = scalar_lea.hbm %s126_s1, 128 }
  0x1d   :  { %p76_p13 = scmp.ne.s32.totalorder %s126_s1, %s75_s23  ;;  %p79_p0 = scmp.lt.u32.totalorder %s75_s23, %s126_s1 }
  0x1f   :  { %p81_p1 = pnand %p79_p0, %p76_p13 }
  0x21   :  { %84 = shalt.err (!%p81_p1)
}
  0x22   :  { %33 = dma.vmem_to_hbm [thread:$0]  %s31_s19, 128, %s126_s1, [#allocation4]  }
  0x23   :  { %87 = dma.done.wait [#allocation4], 128  }
  0x24   :  { %88 = vsyncadd [#allocation4], 4294967168 }
  0x25   :  { %37 = vsyncpa [#allocation3], 1 }
  0x26   :  { %38 = vsyncpa [#allocation4], 1 }

// kernel: tpu_custom_call.1
= control target key start
LH: loop header
LB: loop body
LE: loop exit
PB: predicated region body
PF: predicated region fallthrough
CT: control target
= control target key end

     0   :  { %9 = vsyncpa [#allocation3], 0  ;;  %s1917_s0 = inlined_call_operand.hbm [shape: f32[128,128], index: 0, kind: input, shape index: {}]   ;;  %s1918_s1 = inlined_call_operand.hbm [shape: f32[128,128], index: 1, kind: input, shape index: {}]   ;;  %s1919_s2 = inlined_call_operand.hbm [shape: f32[128,128], index: 2, kind: output, shape index: {0}]   ;;  %s1920_s3 = inlined_call_operand.hbm [shape: f32[128,128], index: 3, kind: output, shape index: {1}]  }
   0x1   :  { %10 = vsyncpa [#allocation6], 0 }
   0x2   :  { %11 = vsyncpa [#allocation4], 0 }
   0x3   :  { %12 = vsyncpa [#allocation9], 0  ;;  %s1368_s12 = smov [#allocation2]   ;;  %s1272_s16 = scalar_lea.hbm %s1917_s0, 2048 }
   0x4   :  { %s18_s13 = sshll.u32 %s1368_s12, 4  ;;  %p1273_p0 = scmp.ne.s32.totalorder %s1917_s0, %s1272_s16  ;;  %s19_s13 = int_to_ptr.vmem [resolvable:$true] %s18_s13 }
   0x5   :  { %p1276_p1 = scmp.lt.u32.totalorder %s1272_s16, %s1917_s0 }
   0x7   :  { %p1278_p2 = pnand %p1276_p1, %p1273_p0 }
   0x9   :  { %1281 = shalt.err (!%p1278_p2)
}
   0xa   :  { %s1282_s21 = scalar_lea.vmem %s19_s13, 2048  ;;  %p1287_p4 = scmp.lt.s32.totalorder %s19_s13, %s19_s13 }
   0xb   :  { %p1283_p3 = scmp.ne.s32.totalorder %s19_s13, %s1282_s21  ;;  %p1288_p5 = scmp.lt.s32.totalorder %s1282_s21, %s1282_s21 }
   0xd   :  { %p1289_p6 = por %p1288_p5, %p1287_p4 }
   0xf   :  { %p1290_p7 = pnand %p1289_p6, %p1283_p3 }
  0x11   :  { %1293 = shalt.err (!%p1290_p7)
}
  0x12   :  { %s1369_s22 = smov 128   ;;  %s1370_s23 = smov 8  }
  0x13   :  { %24 = dma.hbm_to_vmem [thread:$0]  %s1917_s0, 2048, %s19_s13, [#allocation3], %s1369_s22, %s1369_s22, %s1370_s23  }
  0x14   :  { %s1371_s26 = smov [#allocation5]   ;;  %s1294_s30 = scalar_lea.hbm %s1918_s1, 2048 }
  0x15   :  { %s30_s27 = sshll.u32 %s1371_s26, 4  ;;  %p1295_p8 = scmp.ne.s32.totalorder %s1918_s1, %s1294_s30  ;;  %s31_s27 = int_to_ptr.vmem [resolvable:$true] %s30_s27 }
  0x16   :  { %p1298_p9 = scmp.lt.u32.totalorder %s1294_s30, %s1918_s1 }
  0x18   :  { %p1300_p10 = pnand %p1298_p9, %p1295_p8 }
  0x1a   :  { %1303 = shalt.err (!%p1300_p10)
}
  0x1b   :  { %s1304_s8 = scalar_lea.vmem %s31_s27, 2048  ;;  %p1309_p12 = scmp.lt.s32.totalorder %s31_s27, %s31_s27 }
  0x1c   :  { %p1305_p11 = scmp.ne.s32.totalorder %s31_s27, %s1304_s8  ;;  %p1310_p13 = scmp.lt.s32.totalorder %s1304_s8, %s1304_s8 }
  0x1e   :  { %p1311_p0 = por %p1310_p13, %p1309_p12 }
  0x20   :  { %p1312_p1 = pnand %p1311_p0, %p1305_p11 }
  0x22   :  { %1315 = shalt.err (!%p1312_p1)
}
  0x23   :  { %36 = dma.hbm_to_vmem [thread:$0]  %s1918_s1, 2048, %s31_s27, [#allocation6], %s1369_s22, %s1369_s22, %s1370_s23  }
  0x24   :  { %1360 = dma.done.wait [#allocation3], 2048  }
  0x25   :  { %1361 = vsyncadd [#allocation3], 4294965248 }
  0x26   :  { %1362 = dma.done.wait [#allocation6], 2048  }
  0x27   :  { %1363 = vsyncadd [#allocation6], 4294965248  ;;  %v1424_v0 = vld [vmem:[#allocation2] sm:$0xff]  ;;  %v1426_v1 = vld [vmem:[#allocation2 + $0x10] sm:$0xff]  ;;  %s1372_s1 = smov [#allocation7]  }
  0x28   :  { %v1428_v2 = vld [vmem:[#allocation2 + $0x8] sm:$0xff]  ;;  %v75_v3 = vmul.f32 %v1424_v0, %v1424_v0  ;;  %v77_v4 = vmul.f32 %v1426_v1, %v1426_v1  ;;  %v1434_v5 = vld [vmem:[#allocation2 + $0x18] sm:$0xff]  ;;  %v1440_v8 = vld [vmem:[#allocation2 + $0x20] sm:$0xff]  ;;  %s837_s10 = sshll.u32 %s1372_s1, 4  ;;  %s838_s10 = int_to_ptr.vmem [resolvable:$true] %s837_s10 }
  0x29   :  { %v76_v6 = vmul.f32 %v1428_v2, %v1428_v2  ;;  %v78_v7 = vmul.f32 %v1434_v5, %v1434_v5  ;;  %v1442_v9 = vld [vmem:[#allocation2 + $0x28] sm:$0xff]  ;;  %v59_v10 = vld [vmem:[#allocation5] sm:$0xff]  ;;  %v1447_v13 = vld [vmem:[#allocation5 + $0x10] sm:$0xff]  ;;  %v79_v15 = vmul.f32 %v1440_v8, %v1440_v8  ;;  %s1316_s11 = scalar_lea.vmem %s838_s10, 2048  ;;  %p1321_p3 = scmp.lt.s32.totalorder %s838_s10, %s838_s10 }
  0x2a   :  { %91 = vadd.xlane.f32.xlu0 %v75_v3  ;;  %95 = vadd.xlane.f32.xlu1 %v77_v4  ;;  %v1444_v11 = vld [vmem:[#allocation5 + $0x8] sm:$0xff]  ;;  %v1449_v14 = vld [vmem:[#allocation5 + $0x18] sm:$0xff]  ;;  %v80_v16 = vmul.f32 %v1442_v9, %v1442_v9  ;;  %v1457_v18 = vld [vmem:[#allocation2 + $0x30] sm:$0xff]  ;;  %p1317_p2 = scmp.ne.s32.totalorder %s838_s10, %s1316_s11  ;;  %p1322_p4 = scmp.lt.s32.totalorder %s1316_s11, %s1316_s11 }
  0x2b   :  { %v1042_v12 = vpack.c.bf16 %v1444_v11, %v59_v10  ;;  %1018 = vmatprep.mubr.f32.mxu1 %v59_v10  ;;  %v1046_v17 = vpack.c.bf16 %v1449_v14, %v1447_v13  ;;  %v1459_v19 = vld [vmem:[#allocation2 + $0x38] sm:$0xff]  ;;  %v81_v20 = vmul.f32 %v1457_v18, %v1457_v18  ;;  %v1465_v22 = vld [vmem:[#allocation5 + $0x20] sm:$0xff]  ;;  %v1467_v23 = vld [vmem:[#allocation5 + $0x28] sm:$0xff] }
  0x2c   :  { %v82_v21 = vmul.f32 %v1459_v19, %v1459_v19  ;;  %v1469_v24 = vld [vmem:[#allocation2 + $0x40] sm:$0xff]  ;;  %v1471_v25 = vld [vmem:[#allocation2 + $0x48] sm:$0xff]  ;;  %v1050_v26 = vpack.c.bf16 %v1467_v23, %v1465_v22  ;;  %v1479_v29 = vld [vmem:[#allocation2 + $0x50] sm:$0xff]  ;;  %p1323_p5 = por %p1322_p4, %p1321_p3 }
  0x2d   :  { %1043 = vmatprep.subr.bf16.mxu0 %v1042_v12  ;;  %v83_v27 = vmul.f32 %v1469_v24, %v1469_v24  ;;  %v84_v28 = vmul.f32 %v1471_v25, %v1471_v25  ;;  %v1481_v30 = vld [vmem:[#allocation2 + $0x58] sm:$0xff]  ;;  %v85_v31 = vmul.f32 %v1479_v29, %v1479_v29  ;;  %v1487_v33 = vld [vmem:[#allocation5 + $0x30] sm:$0xff]  ;;  %v1491_v35 = vld [vmem:[#allocation2 + $0x60] sm:$0xff] }
  0x2e   :  { %93 = vadd.xlane.f32.xlu0 %v76_v6  ;;  %97 = vadd.xlane.f32.xlu1 %v78_v7  ;;  %v86_v32 = vmul.f32 %v1481_v30, %v1481_v30  ;;  %v1489_v34 = vld [vmem:[#allocation5 + $0x38] sm:$0xff]  ;;  %v1493_v36 = vld [vmem:[#allocation2 + $0x68] sm:$0xff]  ;;  %v87_v38 = vmul.f32 %v1491_v35, %v1491_v35  ;;  %v1501_v40 = vld [vmem:[#allocation2 + $0x70] sm:$0xff]  ;;  %p1324_p6 = pnand %p1323_p5, %p1317_p2 }
  0x2f   :  { %1045 = vmatpush3.bf16.xpose.msra.mxu0 %v1042_v12  ;;  %v1054_v37 = vpack.c.bf16 %v1489_v34, %v1487_v33  ;;  %v88_v39 = vmul.f32 %v1493_v36, %v1493_v36  ;;  %v1503_v41 = vld [vmem:[#allocation2 + $0x78] sm:$0xff]  ;;  %v89_v42 = vmul.f32 %v1501_v40, %v1501_v40  ;;  %v1509_v44 = vld [vmem:[#allocation5 + $0x40] sm:$0xff]  ;;  %v1511_v45 = vld [vmem:[#allocation5 + $0x48] sm:$0xff] }
  0x30   :  { %1047 = vmatprep.subr.bf16.mxu0 %v1046_v17  ;;  %v90_v43 = vmul.f32 %v1503_v41, %v1503_v41  ;;  %v1058_v46 = vpack.c.bf16 %v1511_v45, %v1509_v44  ;;  %v1515_v47 = vld [vmem:[#allocation5 + $0x50] sm:$0xff]  ;;  %v1517_v48 = vld [vmem:[#allocation5 + $0x58] sm:$0xff]  ;;  %v1521_v50 = vld [vmem:[#allocation5 + $0x60] sm:$0xff] }
  0x31   :  { %v1062_v49 = vpack.c.bf16 %v1517_v48, %v1515_v47  ;;  %v1523_v51 = vld [vmem:[#allocation5 + $0x68] sm:$0xff]  ;;  %v1527_v53 = vld [vmem:[#allocation5 + $0x70] sm:$0xff]  ;;  %v1529_v54 = vld [vmem:[#allocation5 + $0x78] sm:$0xff] }
  0x32   :  { %99 = vadd.xlane.f32.xlu0 %v79_v15  ;;  %101 = vadd.xlane.f32.xlu1 %v80_v16  ;;  %v1066_v52 = vpack.c.bf16 %v1523_v51, %v1521_v50  ;;  %v1070_v55 = vpack.c.bf16 %v1529_v54, %v1527_v53 }
  0x36   :  { %103 = vadd.xlane.f32.xlu0 %v81_v20  ;;  %105 = vadd.xlane.f32.xlu1 %v82_v21 }
  0x37   :  { %1049 = vmatpush3.bf16.xpose.msra.mxu0 %v1046_v17 }
  0x38   :  { %1051 = vmatprep.subr.bf16.mxu0 %v1050_v26 }
  0x3a   :  { %107 = vadd.xlane.f32.xlu0 %v83_v27  ;;  %109 = vadd.xlane.f32.xlu1 %v84_v28 }
  0x3e   :  { %111 = vadd.xlane.f32.xlu0 %v85_v31  ;;  %113 = vadd.xlane.f32.xlu1 %v86_v32 }
  0x3f   :  { %1053 = vmatpush3.bf16.xpose.msra.mxu0 %v1050_v26 }
  0x40   :  { %1055 = vmatprep.subr.bf16.mxu0 %v1054_v37 }
  0x42   :  { %115 = vadd.xlane.f32.xlu0 %v87_v38  ;;  %117 = vadd.xlane.f32.xlu1 %v88_v39 }
  0x46   :  { %119 = vadd.xlane.f32.xlu0 %v89_v42  ;;  %121 = vadd.xlane.f32.xlu1 %v90_v43 }
  0x47   :  { %1057 = vmatpush3.bf16.xpose.msra.mxu0 %v1054_v37 }
  0x48   :  { %1059 = vmatprep.subr.bf16.mxu0 %v1058_v46 }
  0x4f   :  { %1061 = vmatpush3.bf16.xpose.msra.mxu0 %v1058_v46 }
  0x50   :  { %1063 = vmatprep.subr.bf16.mxu0 %v1062_v49 }
  0x57   :  { %1065 = vmatpush3.bf16.xpose.msra.mxu0 %v1062_v49 }
  0x58   :  { %1067 = vmatprep.subr.bf16.mxu0 %v1066_v52 }
  0x5f   :  { %1069 = vmatpush3.bf16.xpose.msra.mxu0 %v1066_v52 }
  0x60   :  { %1071 = vmatprep.subr.bf16.mxu0 %v1070_v55 }
  0x67   :  { %1073 = vmatpush3.bf16.xpose.msra.mxu0 %v1070_v55 }
  0xb7   :  { %v92_v56 = vpop.xlane.xlu0 %91  ;;  %v96_v57 = vpop.xlane.xlu1 %95 }
  0xb8   :  { %v123_v58 = vmax.f32 %v92_v56, 1e-30  ;;  %v125_v59 = vmax.f32 %v96_v57, 1e-30 }
  0xba   :  { %1112 = vrsqrt.f32 %v123_v58 }
  0xbb   :  { %1114 = vrsqrt.f32 %v125_v59  ;;  %v94_v60 = vpop.xlane.xlu0 %93  ;;  %v98_v61 = vpop.xlane.xlu1 %97 }
  0xbc   :  { %v124_v62 = vmax.f32 %v94_v60, 1e-30  ;;  %v126_v63 = vmax.f32 %v98_v61, 1e-30 }
  0xbe   :  { %1116 = vrsqrt.f32 %v124_v62 }
  0xbf   :  { %1118 = vrsqrt.f32 %v126_v63  ;;  %v100_v3 = vpop.xlane.xlu0 %99  ;;  %v102_v4 = vpop.xlane.xlu1 %101 }
  0xc0   :  { %v127_v6 = vmax.f32 %v100_v3, 1e-30  ;;  %v128_v7 = vmax.f32 %v102_v4, 1e-30 }
  0xc2   :  { %1120 = vrsqrt.f32 %v127_v6 }
  0xc3   :  { %1122 = vrsqrt.f32 %v128_v7  ;;  %v104_v10 = vpop.xlane.xlu0 %103  ;;  %v106_v12 = vpop.xlane.xlu1 %105 }
  0xc4   :  { %v1113_v15 = vpop.eup %1112  ;;  %v129_v16 = vmax.f32 %v104_v10, 1e-30  ;;  %v130_v17 = vmax.f32 %v106_v12, 1e-30 }
  0xc5   :  { %v1115_v20 = vpop.eup %1114  ;;  %v155_v21 = vmul.f32 100.0, %v1113_v15 }
  0xc6   :  { %v157_v26 = vmul.f32 100.0, %v1115_v20  ;;  %1124 = vrsqrt.f32 %v129_v16 }
  0xc7   :  { %1126 = vrsqrt.f32 %v130_v17  ;;  %v171_v27 = vmul.f32 %v155_v21, %v1424_v0  ;;  %v108_v28 = vpop.xlane.xlu0 %107  ;;  %v110_v31 = vpop.xlane.xlu1 %109 }
  0xc8   :  { %v1117_v32 = vpop.eup %1116  ;;  %v131_v37 = vmax.f32 %v108_v28, 1e-30  ;;  %v132_v38 = vmax.f32 %v110_v31, 1e-30  ;;  %v173_v46 = vmul.f32 %v157_v26, %v1426_v1 }
  0xc9   :  { %v1119_v39 = vpop.eup %1118  ;;  %v156_v42 = vmul.f32 100.0, %v1117_v32  ;;  %962 = vmatprep.mubr.f32.mxu0 %v171_v27 }
  0xca   :  { %v158_v43 = vmul.f32 100.0, %v1119_v39  ;;  %1128 = vrsqrt.f32 %v131_v37 }
  0xcb   :  { %1130 = vrsqrt.f32 %v132_v38  ;;  %v172_v49 = vmul.f32 %v156_v42, %v1428_v2  ;;  %v112_v52 = vpop.xlane.xlu0 %111  ;;  %v114_v55 = vpop.xlane.xlu1 %113 }
  0xcc   :  { %v1121_v56 = vpop.eup %1120  ;;  %v133_v57 = vmax.f32 %v112_v52, 1e-30  ;;  %v134_v0 = vmax.f32 %v114_v55, 1e-30  ;;  %v174_v58 = vmul.f32 %v158_v43, %v1434_v5 }
  0xcd   :  { %v1123_v59 = vpop.eup %1122  ;;  %v159_v60 = vmul.f32 100.0, %v1121_v56  ;;  %963 = vmatmul.mubr.f32.vlgmr.msra.gmra.mrb[0].mxu0 %v172_v49  ;;  %v1074_v61 = vpack.c.bf16 %v172_v49, %v171_v27 }
  0xce   :  { %v160_v62 = vmul.f32 100.0, %v1123_v59  ;;  %1132 = vrsqrt.f32 %v133_v57  ;;  %965 = vmatprep.mubr.f32.mxu0 %v173_v46  ;;  %v1078_v63 = vpack.c.bf16 %v174_v58, %v173_v46 }
  0xcf   :  { %1134 = vrsqrt.f32 %v134_v0  ;;  %1075 = vmatprep.subr.bf16.mxu1 %v1074_v61  ;;  %v116_v1 = vpop.xlane.xlu0 %115  ;;  %v118_v3 = vpop.xlane.xlu1 %117  ;;  %v175_v2 = vmul.f32 %v159_v60, %v1440_v8 }
  0xd0   :  { %v1125_v4 = vpop.eup %1124  ;;  %1077 = vmatpush3.bf16.xpose.msra.mxu1 %v1074_v61  ;;  %v135_v6 = vmax.f32 %v116_v1, 1e-30  ;;  %v136_v7 = vmax.f32 %v118_v3, 1e-30  ;;  %v176_v12 = vmul.f32 %v160_v62, %v1442_v9 }
  0xd1   :  { %v1127_v10 = vpop.eup %1126  ;;  %v161_v5 = vmul.f32 100.0, %v1125_v4  ;;  %966 = vmatmul.mubr.f32.gmra.mrb[2].mxu0 %v174_v58  ;;  %1079 = vmatprep.subr.bf16.mxu1 %v1078_v63 }
  0xd2   :  { %v162_v15 = vmul.f32 100.0, %v1127_v10  ;;  %1136 = vrsqrt.f32 %v135_v6  ;;  %968 = vmatprep.mubr.f32.mxu0 %v175_v2  ;;  %v1082_v32 = vpack.c.bf16 %v176_v12, %v175_v2 }
  0xd3   :  { %1138 = vrsqrt.f32 %v136_v7  ;;  %v120_v16 = vpop.xlane.xlu0 %119  ;;  %v122_v17 = vpop.xlane.xlu1 %121  ;;  %v177_v20 = vmul.f32 %v161_v5, %v1457_v18 }
  0xd4   :  { %v1129_v21 = vpop.eup %1128  ;;  %v137_v8 = vmax.f32 %v120_v16, 1e-30  ;;  %v138_v26 = vmax.f32 %v122_v17, 1e-30  ;;  %v178_v31 = vmul.f32 %v162_v15, %v1459_v19 }
  0xd5   :  { %v1131_v27 = vpop.eup %1130  ;;  %v163_v28 = vmul.f32 100.0, %v1129_v21  ;;  %969 = vmatmul.mubr.f32.gmra.mrb[4].mxu0 %v176_v12 }
  0xd6   :  { %v164_v37 = vmul.f32 100.0, %v1131_v27  ;;  %1140 = vrsqrt.f32 %v137_v8  ;;  %971 = vmatprep.mubr.f32.mxu0 %v177_v20  ;;  %v1086_v56 = vpack.c.bf16 %v178_v31, %v177_v20 }
  0xd7   :  { %1142 = vrsqrt.f32 %v138_v26  ;;  %v179_v9 = vmul.f32 %v163_v28, %v1469_v24 }
  0xd8   :  { %v1133_v38 = vpop.eup %1132  ;;  %1081 = vmatpush3.bf16.xpose.msra.mxu1 %v1078_v63  ;;  %v180_v18 = vmul.f32 %v164_v37, %v1471_v25 }
  0xd9   :  { %v1135_v39 = vpop.eup %1134  ;;  %v165_v42 = vmul.f32 100.0, %v1133_v38  ;;  %972 = vmatmul.mubr.f32.gmra.mrb[6].mxu0 %v178_v31  ;;  %1083 = vmatprep.subr.bf16.mxu1 %v1082_v32 }
  0xda   :  { %v166_v43 = vmul.f32 100.0, %v1135_v39  ;;  %974 = vmatprep.mubr.f32.mxu0 %v179_v9  ;;  %v1090_v61 = vpack.c.bf16 %v180_v18, %v179_v9 }
  0xdb   :  { %v181_v46 = vmul.f32 %v165_v42, %v1479_v29 }
  0xdc   :  { %v1137_v19 = vpop.eup %1136  ;;  %v182_v55 = vmul.f32 %v166_v43, %v1481_v30 }
  0xdd   :  { %v1139_v49 = vpop.eup %1138  ;;  %v167_v52 = vmul.f32 100.0, %v1137_v19  ;;  %975 = vmatmul.mubr.f32.gmra.mrb[8].mxu0 %v180_v18 }
  0xde   :  { %v168_v24 = vmul.f32 100.0, %v1139_v49  ;;  %977 = vmatprep.mubr.f32.mxu0 %v181_v46 }
  0xdf   :  { %v183_v57 = vmul.f32 %v167_v52, %v1491_v35  ;;  %v1094_v35 = vpack.c.bf16 %v182_v55, %v181_v46 }
  0xe0   :  { %v1141_v0 = vpop.eup %1140  ;;  %1085 = vmatpush3.bf16.xpose.msra.mxu1 %v1082_v32  ;;  %v184_v59 = vmul.f32 %v168_v24, %v1493_v36 }
  0xe1   :  { %v1143_v58 = vpop.eup %1142  ;;  %v169_v25 = vmul.f32 100.0, %v1141_v0  ;;  %978 = vmatmul.mubr.f32.gmra.mrb[10].mxu0 %v182_v55  ;;  %1087 = vmatprep.subr.bf16.mxu1 %v1086_v56 }
  0xe2   :  { %v170_v29 = vmul.f32 100.0, %v1143_v58  ;;  %980 = vmatprep.mubr.f32.mxu0 %v183_v57  ;;  %v1098_v62 = vpack.c.bf16 %v184_v59, %v183_v57 }
  0xe3   :  { %v185_v60 = vmul.f32 %v169_v25, %v1501_v40 }
  0xe4   :  { %v186_v30 = vmul.f32 %v170_v29, %v1503_v41 }
  0xe5   :  { %981 = vmatmul.mubr.f32.gmra.mrb[12].mxu0 %v184_v59 }
  0xe6   :  { %983 = vmatprep.mubr.f32.mxu0 %v185_v60  ;;  %v1102_v36 = vpack.c.bf16 %v186_v30, %v185_v60 }
  0xe8   :  { %1089 = vmatpush3.bf16.xpose.msra.mxu1 %v1086_v56 }
  0xe9   :  { %984 = vmatmul.mubr.f32.gmra.mrb[14].mxu0 %v186_v30  ;;  %1091 = vmatprep.subr.bf16.mxu1 %v1090_v61 }
  0xf0   :  { %1093 = vmatpush3.bf16.xpose.msra.mxu1 %v1090_v61 }
  0xf1   :  { %1095 = vmatprep.subr.bf16.mxu1 %v1094_v35 }
  0xf8   :  { %1097 = vmatpush3.bf16.xpose.msra.mxu1 %v1094_v35 }
  0xf9   :  { %1099 = vmatprep.subr.bf16.mxu1 %v1098_v62 }
 0x100   :  { %1101 = vmatpush3.bf16.xpose.msra.mxu1 %v1098_v62 }
 0x101   :  { %1103 = vmatprep.subr.bf16.mxu1 %v1102_v36 }
 0x108   :  { %1105 = vmatpush3.bf16.xpose.msra.mxu1 %v1102_v36 }
 0x10f   :  { %1019 = vmatmul.mubr.f32.vlgmr.msra.gmra.mrb[0].mxu1 %v1444_v11  ;;  %v332_v11 = vlaneseq }
 0x110   :  { %1021 = vmatprep.mubr.f32.mxu1 %v1447_v13 }
 0x111   :  { %v1564_v13 = vand.u32 127, %v332_v11 }
 0x113   :  { %1022 = vmatmul.mubr.f32.gmra.mrb[2].mxu1 %v1449_v14  ;;  %vm334_vm0 = vcmp.lt.s32.totalorder %v1564_v13, 8 }
 0x114   :  { %1024 = vmatprep.mubr.f32.mxu1 %v1465_v22 }
 0x117   :  { %1025 = vmatmul.mubr.f32.gmra.mrb[4].mxu1 %v1467_v23 }
 0x118   :  { %1027 = vmatprep.mubr.f32.mxu1 %v1487_v33 }
 0x11b   :  { %1028 = vmatmul.mubr.f32.gmra.mrb[6].mxu1 %v1489_v34 }
 0x11c   :  { %1030 = vmatprep.mubr.f32.mxu1 %v1509_v44 }
 0x11f   :  { %1031 = vmatmul.mubr.f32.gmra.mrb[8].mxu1 %v1511_v45 }
 0x120   :  { %1033 = vmatprep.mubr.f32.mxu1 %v1515_v47 }
 0x123   :  { %1034 = vmatmul.mubr.f32.gmra.mrb[10].mxu1 %v1517_v48 }
 0x124   :  { %1036 = vmatprep.mubr.f32.mxu1 %v1521_v50 }
 0x127   :  { %1037 = vmatmul.mubr.f32.gmra.mrb[12].mxu1 %v1523_v51 }
 0x128   :  { %1039 = vmatprep.mubr.f32.mxu1 %v1527_v53 }
 0x12b   :  { %1040 = vmatmul.mubr.f32.gmra.mrb[14].mxu1 %v1529_v54 }
 0x1a0   :  { %v964_v14 = vpop.f32.mrb[0].mxu0 }
 0x1a1   :  { %v253_v22 = vpop.f32.mrb[1].mxu0  ;;  %v1569_v23 = vsel %vm334_vm0, %v964_v14, -inf }
 0x1a2   :  { %353 = vmax.xlane.f32.xlu1 %v1569_v23  ;;  %v1574_v33 = vsel %vm334_vm0, %v253_v22, -inf }
 0x1a3   :  { %351 = vmax.xlane.f32.xlu0 %v1574_v33 }
 0x1a4   :  { %v967_v34 = vpop.f32.mrb[2].mxu0 }
 0x1a5   :  { %v263_v40 = vpop.f32.mrb[3].mxu0  ;;  %v1579_v41 = vsel %vm334_vm0, %v967_v34, -inf }
 0x1a6   :  { %357 = vmax.xlane.f32.xlu1 %v1579_v41  ;;  %v1584_v44 = vsel %vm334_vm0, %v263_v40, -inf }
 0x1a7   :  { %355 = vmax.xlane.f32.xlu0 %v1584_v44 }
 0x1a8   :  { %v970_v45 = vpop.f32.mrb[4].mxu0 }
 0x1a9   :  { %v273_v47 = vpop.f32.mrb[5].mxu0  ;;  %v1589_v48 = vsel %vm334_vm0, %v970_v45, -inf }
 0x1aa   :  { %361 = vmax.xlane.f32.xlu1 %v1589_v48  ;;  %v1594_v50 = vsel %vm334_vm0, %v273_v47, -inf }
 0x1ab   :  { %359 = vmax.xlane.f32.xlu0 %v1594_v50 }
 0x1ac   :  { %v973_v51 = vpop.f32.mrb[6].mxu0 }
 0x1ad   :  { %v283_v53 = vpop.f32.mrb[7].mxu0  ;;  %v1599_v54 = vsel %vm334_vm0, %v973_v51, -inf }
 0x1ae   :  { %365 = vmax.xlane.f32.xlu1 %v1599_v54  ;;  %v1604_v63 = vsel %vm334_vm0, %v283_v53, -inf }
 0x1af   :  { %363 = vmax.xlane.f32.xlu0 %v1604_v63 }
 0x1b0   :  { %v976_v1 = vpop.f32.mrb[8].mxu0 }
 0x1b1   :  { %v293_v3 = vpop.f32.mrb[9].mxu0  ;;  %v1609_v2 = vsel %vm334_vm0, %v976_v1, -inf }
 0x1b2   :  { %369 = vmax.xlane.f32.xlu1 %v1609_v2  ;;  %v1614_v4 = vsel %vm334_vm0, %v293_v3, -inf }
 0x1b3   :  { %367 = vmax.xlane.f32.xlu0 %v1614_v4 }
 0x1b4   :  { %v979_v6 = vpop.f32.mrb[10].mxu0 }
 0x1b5   :  { %v303_v7 = vpop.f32.mrb[11].mxu0  ;;  %v1619_v10 = vsel %vm334_vm0, %v979_v6, -inf }
 0x1b6   :  { %373 = vmax.xlane.f32.xlu1 %v1619_v10  ;;  %v1624_v5 = vsel %vm334_vm0, %v303_v7, -inf }
 0x1b7   :  { %371 = vmax.xlane.f32.xlu0 %v1624_v5 }
 0x1b8   :  { %v982_v12 = vpop.f32.mrb[12].mxu0 }
 0x1b9   :  { %v313_v15 = vpop.f32.mrb[13].mxu0  ;;  %v1629_v16 = vsel %vm334_vm0, %v982_v12, -inf }
 0x1ba   :  { %377 = vmax.xlane.f32.xlu1 %v1629_v16  ;;  %v1634_v17 = vsel %vm334_vm0, %v313_v15, -inf }
 0x1bb   :  { %375 = vmax.xlane.f32.xlu0 %v1634_v17 }
 0x1bc   :  { %v985_v20 = vpop.f32.mrb[14].mxu0 }
 0x1bd   :  { %v323_v21 = vpop.f32.mrb[15].mxu0  ;;  %v1639_v8 = vsel %vm334_vm0, %v985_v20, -inf }
 0x1be   :  { %381 = vmax.xlane.f32.xlu1 %v1639_v8  ;;  %v1644_v26 = vsel %vm334_vm0, %v323_v21, -inf }
 0x1bf   :  { %379 = vmax.xlane.f32.xlu0 %v1644_v26 }
 0x1e2   :  { %v1020_v27 = vpop.f32.mrb[0].mxu1 }
 0x1e3   :  { %v577_v28 = vpop.f32.mrb[1].mxu1  ;;  %v1649_v31 = vsel %vm334_vm0, %v1020_v27, -inf }
 0x1e4   :  { %674 = vmax.xlane.f32.xlu1 %v1649_v31  ;;  %v1654_v32 = vsel %vm334_vm0, %v577_v28, -inf }
 0x1e5   :  { %672 = vmax.xlane.f32.xlu0 %v1654_v32 }
 0x1e6   :  { %v1023_v37 = vpop.f32.mrb[2].mxu1 }
 0x1e7   :  { %v587_v9 = vpop.f32.mrb[3].mxu1  ;;  %v1659_v38 = vsel %vm334_vm0, %v1023_v37, -inf }
 0x1e8   :  { %678 = vmax.xlane.f32.xlu1 %v1659_v38  ;;  %v1664_v39 = vsel %vm334_vm0, %v587_v9, -inf }
 0x1e9   :  { %676 = vmax.xlane.f32.xlu0 %v1664_v39 }
 0x1ea   :  { %v1026_v42 = vpop.f32.mrb[4].mxu1 }
 0x1eb   :  { %v597_v18 = vpop.f32.mrb[5].mxu1  ;;  %v1669_v43 = vsel %vm334_vm0, %v1026_v42, -inf }
 0x1ec   :  { %682 = vmax.xlane.f32.xlu1 %v1669_v43  ;;  %v1674_v46 = vsel %vm334_vm0, %v597_v18, -inf }
 0x1ed   :  { %680 = vmax.xlane.f32.xlu0 %v1674_v46 }
 0x1ee   :  { %v1029_v19 = vpop.f32.mrb[6].mxu1 }
 0x1ef   :  { %v607_v49 = vpop.f32.mrb[7].mxu1  ;;  %v1679_v52 = vsel %vm334_vm0, %v1029_v19, -inf }
 0x1f0   :  { %686 = vmax.xlane.f32.xlu1 %v1679_v52  ;;  %v1684_v55 = vsel %vm334_vm0, %v607_v49, -inf }
 0x1f1   :  { %684 = vmax.xlane.f32.xlu0 %v1684_v55 }
 0x1f2   :  { %v1032_v56 = vpop.f32.mrb[8].mxu1 }
 0x1f3   :  { %v617_v24 = vpop.f32.mrb[9].mxu1  ;;  %v1689_v57 = vsel %vm334_vm0, %v1032_v56, -inf }
 0x1f4   :  { %690 = vmax.xlane.f32.xlu1 %v1689_v57  ;;  %v1694_v0 = vsel %vm334_vm0, %v617_v24, -inf }
 0x1f5   :  { %688 = vmax.xlane.f32.xlu0 %v1694_v0 }
 0x1f6   :  { %v1035_v58 = vpop.f32.mrb[10].mxu1 }
 0x1f7   :  { %v627_v25 = vpop.f32.mrb[11].mxu1  ;;  %v1699_v59 = vsel %vm334_vm0, %v1035_v58, -inf }
 0x1f8   :  { %694 = vmax.xlane.f32.xlu1 %v1699_v59  ;;  %v1704_v29 = vsel %vm334_vm0, %v627_v25, -inf }
 0x1f9   :  { %692 = vmax.xlane.f32.xlu0 %v1704_v29 }
 0x1fa   :  { %v1038_v60 = vpop.f32.mrb[12].mxu1 }
 0x1fb   :  { %v637_v30 = vpop.f32.mrb[13].mxu1  ;;  %v1709_v61 = vsel %vm334_vm0, %v1038_v60, -inf }
 0x1fc   :  { %698 = vmax.xlane.f32.xlu1 %v1709_v61  ;;  %v1714_v35 = vsel %vm334_vm0, %v637_v30, -inf }
 0x1fd   :  { %696 = vmax.xlane.f32.xlu0 %v1714_v35 }
 0x1fe   :  { %v1041_v62 = vpop.f32.mrb[14].mxu1 }
 0x1ff   :  { %v647_v36 = vpop.f32.mrb[15].mxu1  ;;  %v1719_v11 = vsel %vm334_vm0, %v1041_v62, -inf }
 0x200   :  { %702 = vmax.xlane.f32.xlu1 %v1719_v11  ;;  %v1724_v14 = vsel %vm334_vm0, %v647_v36, -inf }
 0x201   :  { %700 = vmax.xlane.f32.xlu0 %v1724_v14 }
 0x22f   :  { %v354_v22 = vpop.xlane.xlu1 %353 }
 0x230   :  { %v384_v34 = vsub.f32 %v1569_v23, %v354_v22  ;;  %v352_v40 = vpop.xlane.xlu0 %351 }
 0x231   :  { %v383_v45 = vsub.f32 %v1574_v33, %v352_v40 }
 0x232   :  { %v401_v47 = vmul.f32 1.442695, %v384_v34 }
 0x233   :  { %v399_v51 = vmul.f32 1.442695, %v383_v45  ;;  %v358_v53 = vpop.xlane.xlu1 %357 }
 0x234   :  { %1144 = vpow2.f32 %v401_v47  ;;  %v386_v1 = vsub.f32 %v1579_v41, %v358_v53  ;;  %v356_v3 = vpop.xlane.xlu0 %355 }
 0x235   :  { %1146 = vpow2.f32 %v399_v51  ;;  %v385_v13 = vsub.f32 %v1584_v44, %v356_v3 }
 0x236   :  { %v405_v6 = vmul.f32 1.442695, %v386_v1 }
 0x237   :  { %v403_v7 = vmul.f32 1.442695, %v385_v13  ;;  %v362_v12 = vpop.xlane.xlu1 %361 }
 0x238   :  { %1148 = vpow2.f32 %v405_v6  ;;  %v388_v15 = vsub.f32 %v1589_v48, %v362_v12  ;;  %v360_v23 = vpop.xlane.xlu0 %359 }
 0x239   :  { %1150 = vpow2.f32 %v403_v7  ;;  %v387_v33 = vsub.f32 %v1594_v50, %v360_v23 }
 0x23a   :  { %v409_v20 = vmul.f32 1.442695, %v388_v15 }
 0x23b   :  { %v407_v21 = vmul.f32 1.442695, %v387_v33  ;;  %v366_v27 = vpop.xlane.xlu1 %365 }
 0x23c   :  { %1152 = vpow2.f32 %v409_v20  ;;  %v390_v41 = vsub.f32 %v1599_v54, %v366_v27  ;;  %v364_v28 = vpop.xlane.xlu0 %363 }
 0x23d   :  { %1154 = vpow2.f32 %v407_v21  ;;  %v389_v44 = vsub.f32 %v1604_v63, %v364_v28 }
 0x23e   :  { %v1735_v37 = vpop.eup %1144  ;;  %v413_v9 = vmul.f32 1.442695, %v390_v41 }
 0x23f   :  { %v1737_v42 = vpop.eup %1146  ;;  %v411_v48 = vmul.f32 1.442695, %v389_v44  ;;  %v370_v18 = vpop.xlane.xlu1 %369  ;;  %433 = vadd.xlane.f32.xlu1 %v1735_v37 }
 0x240   :  { %1156 = vpow2.f32 %v413_v9  ;;  %v392_v50 = vsub.f32 %v1609_v2, %v370_v18  ;;  %431 = vadd.xlane.f32.xlu0 %v1737_v42  ;;  %v368_v19 = vpop.xlane.xlu0 %367 }
 0x241   :  { %1158 = vpow2.f32 %v411_v48  ;;  %v391_v54 = vsub.f32 %v1614_v4, %v368_v19 }
 0x242   :  { %v1743_v49 = vpop.eup %1148  ;;  %v417_v63 = vmul.f32 1.442695, %v392_v50 }
 0x243   :  { %v1745_v56 = vpop.eup %1150  ;;  %v415_v24 = vmul.f32 1.442695, %v391_v54  ;;  %v374_v58 = vpop.xlane.xlu1 %373  ;;  %437 = vadd.xlane.f32.xlu1 %v1743_v49 }
 0x244   :  { %1160 = vpow2.f32 %v417_v63  ;;  %v394_v25 = vsub.f32 %v1619_v10, %v374_v58  ;;  %435 = vadd.xlane.f32.xlu0 %v1745_v56  ;;  %v372_v2 = vpop.xlane.xlu0 %371 }
 0x245   :  { %1162 = vpow2.f32 %v415_v24  ;;  %v393_v60 = vsub.f32 %v1624_v5, %v372_v2 }
 0x246   :  { %v1751_v30 = vpop.eup %1152  ;;  %v421_v4 = vmul.f32 1.442695, %v394_v25 }
 0x247   :  { %v1753_v62 = vpop.eup %1154  ;;  %v419_v36 = vmul.f32 1.442695, %v393_v60  ;;  %v378_v22 = vpop.xlane.xlu1 %377  ;;  %441 = vadd.xlane.f32.xlu1 %v1751_v30 }
 0x248   :  { %1164 = vpow2.f32 %v421_v4  ;;  %v396_v34 = vsub.f32 %v1629_v16, %v378_v22  ;;  %439 = vadd.xlane.f32.xlu0 %v1753_v62  ;;  %v376_v10 = vpop.xlane.xlu0 %375 }
 0x249   :  { %1166 = vpow2.f32 %v419_v36  ;;  %v395_v40 = vsub.f32 %v1634_v17, %v376_v10 }
 0x24a   :  { %v1759_v45 = vpop.eup %1156  ;;  %v425_v5 = vmul.f32 1.442695, %v396_v34 }
 0x24b   :  { %v1761_v47 = vpop.eup %1158  ;;  %v423_v51 = vmul.f32 1.442695, %v395_v40  ;;  %445 = vadd.xlane.f32.xlu1 %v1759_v45  ;;  %v382_v53 = vpop.xlane.xlu1 %381 }
 0x24c   :  { %1168 = vpow2.f32 %v425_v5  ;;  %v398_v1 = vsub.f32 %v1639_v8, %v382_v53  ;;  %443 = vadd.xlane.f32.xlu0 %v1761_v47  ;;  %v380_v16 = vpop.xlane.xlu0 %379 }
 0x24d   :  { %1170 = vpow2.f32 %v423_v51  ;;  %v397_v3 = vsub.f32 %v1644_v26, %v380_v16 }
 0x24e   :  { %v1767_v13 = vpop.eup %1160  ;;  %v429_v17 = vmul.f32 1.442695, %v398_v1 }
 0x24f   :  { %v1769_v6 = vpop.eup %1162  ;;  %v427_v7 = vmul.f32 1.442695, %v397_v3  ;;  %449 = vadd.xlane.f32.xlu1 %v1767_v13 }
 0x250   :  { %1172 = vpow2.f32 %v429_v17  ;;  %447 = vadd.xlane.f32.xlu0 %v1769_v6 }
 0x251   :  { %1174 = vpow2.f32 %v427_v7 }
 0x252   :  { %v1773_v12 = vpop.eup %1164 }
 0x253   :  { %v1775_v8 = vpop.eup %1166  ;;  %453 = vadd.xlane.f32.xlu1 %v1773_v12 }
 0x254   :  { %451 = vadd.xlane.f32.xlu0 %v1775_v8 }
 0x256   :  { %v1779_v26 = vpop.eup %1168 }
 0x257   :  { %v1781_v15 = vpop.eup %1170  ;;  %457 = vadd.xlane.f32.xlu1 %v1779_v26 }
 0x258   :  { %455 = vadd.xlane.f32.xlu0 %v1781_v15 }
 0x25a   :  { %v1785_v23 = vpop.eup %1172 }
 0x25b   :  { %v1787_v33 = vpop.eup %1174  ;;  %461 = vadd.xlane.f32.xlu1 %v1785_v23 }
 0x25c   :  { %459 = vadd.xlane.f32.xlu0 %v1787_v33 }
 0x271   :  { %v675_v20 = vpop.xlane.xlu1 %674 }
 0x272   :  { %v705_v21 = vsub.f32 %v1649_v31, %v675_v20  ;;  %v673_v27 = vpop.xlane.xlu0 %672 }
 0x273   :  { %v704_v41 = vsub.f32 %v1654_v32, %v673_v27 }
 0x274   :  { %v722_v28 = vmul.f32 1.442695, %v705_v21 }
 0x275   :  { %v720_v44 = vmul.f32 1.442695, %v704_v41  ;;  %v679_v9 = vpop.xlane.xlu1 %678 }
 0x276   :  { %1176 = vpow2.f32 %v722_v28  ;;  %v707_v48 = vsub.f32 %v1659_v38, %v679_v9  ;;  %v677_v18 = vpop.xlane.xlu0 %676 }
 0x277   :  { %1178 = vpow2.f32 %v720_v44  ;;  %v706_v50 = vsub.f32 %v1664_v39, %v677_v18 }
 0x278   :  { %v726_v19 = vmul.f32 1.442695, %v707_v48 }
 0x279   :  { %v724_v54 = vmul.f32 1.442695, %v706_v50  ;;  %v683_v63 = vpop.xlane.xlu1 %682 }
 0x27a   :  { %1180 = vpow2.f32 %v726_v19  ;;  %v709_v24 = vsub.f32 %v1669_v43, %v683_v63  ;;  %v681_v31 = vpop.xlane.xlu0 %680 }
 0x27b   :  { %1182 = vpow2.f32 %v724_v54  ;;  %v708_v32 = vsub.f32 %v1674_v46, %v681_v31 }
 0x27c   :  { %v730_v58 = vmul.f32 1.442695, %v709_v24 }
 0x27d   :  { %v728_v25 = vmul.f32 1.442695, %v708_v32  ;;  %v687_v2 = vpop.xlane.xlu1 %686 }
 0x27e   :  { %1184 = vpow2.f32 %v730_v58  ;;  %v711_v38 = vsub.f32 %v1679_v52, %v687_v2  ;;  %v685_v60 = vpop.xlane.xlu0 %684 }
 0x27f   :  { %1186 = vpow2.f32 %v728_v25  ;;  %v710_v39 = vsub.f32 %v1684_v55, %v685_v60 }
 0x280   :  { %v1799_v4 = vpop.eup %1176  ;;  %v734_v36 = vmul.f32 1.442695, %v711_v38 }
 0x281   :  { %v1801_v22 = vpop.eup %1178  ;;  %v732_v43 = vmul.f32 1.442695, %v710_v39  ;;  %754 = vadd.xlane.f32.xlu1 %v1799_v4  ;;  %v691_v34 = vpop.xlane.xlu1 %690 }
 0x282   :  { %1188 = vpow2.f32 %v734_v36  ;;  %v713_v46 = vsub.f32 %v1689_v57, %v691_v34  ;;  %752 = vadd.xlane.f32.xlu0 %v1801_v22  ;;  %v689_v10 = vpop.xlane.xlu0 %688 }
 0x283   :  { %1190 = vpow2.f32 %v732_v43  ;;  %v712_v52 = vsub.f32 %v1694_v0, %v689_v10 }
 0x284   :  { %v1807_v40 = vpop.eup %1180  ;;  %v738_v55 = vmul.f32 1.442695, %v713_v46 }
 0x285   :  { %v1809_v5 = vpop.eup %1182  ;;  %v736_v51 = vmul.f32 1.442695, %v712_v52  ;;  %758 = vadd.xlane.f32.xlu1 %v1807_v40  ;;  %v695_v53 = vpop.xlane.xlu1 %694 }
 0x286   :  { %1192 = vpow2.f32 %v738_v55  ;;  %v715_v1 = vsub.f32 %v1699_v59, %v695_v53  ;;  %756 = vadd.xlane.f32.xlu0 %v1809_v5  ;;  %v693_v57 = vpop.xlane.xlu0 %692 }
 0x287   :  { %1194 = vpow2.f32 %v736_v51  ;;  %v714_v16 = vsub.f32 %v1704_v29, %v693_v57 }
 0x288   :  { %v1815_v3 = vpop.eup %1184  ;;  %v742_v0 = vmul.f32 1.442695, %v715_v1 }
 0x289   :  { %v1817_v17 = vpop.eup %1186  ;;  %v740_v7 = vmul.f32 1.442695, %v714_v16  ;;  %762 = vadd.xlane.f32.xlu1 %v1815_v3  ;;  %v699_v20 = vpop.xlane.xlu1 %698 }
 0x28a   :  { %1196 = vpow2.f32 %v742_v0  ;;  %v717_v21 = vsub.f32 %v1709_v61, %v699_v20  ;;  %760 = vadd.xlane.f32.xlu0 %v1817_v17  ;;  %v697_v59 = vpop.xlane.xlu0 %696 }
 0x28b   :  { %1198 = vpow2.f32 %v740_v7  ;;  %v716_v27 = vsub.f32 %v1714_v35, %v697_v59 }
 0x28c   :  { %v1823_v41 = vpop.eup %1188  ;;  %v746_v29 = vmul.f32 1.442695, %v717_v21 }
 0x28d   :  { %v1825_v28 = vpop.eup %1190  ;;  %v744_v44 = vmul.f32 1.442695, %v716_v27  ;;  %766 = vadd.xlane.f32.xlu1 %v1823_v41  ;;  %v703_v9 = vpop.xlane.xlu1 %702 }
 0x28e   :  { %1200 = vpow2.f32 %v746_v29  ;;  %v719_v48 = vsub.f32 %v1719_v11, %v703_v9  ;;  %764 = vadd.xlane.f32.xlu0 %v1825_v28  ;;  %v701_v61 = vpop.xlane.xlu0 %700 }
 0x28f   :  { %1202 = vpow2.f32 %v744_v44  ;;  %v718_v18 = vsub.f32 %v1724_v14, %v701_v61 }
 0x290   :  { %v1831_v50 = vpop.eup %1192  ;;  %v750_v35 = vmul.f32 1.442695, %v719_v48 }
 0x291   :  { %v1833_v19 = vpop.eup %1194  ;;  %v748_v54 = vmul.f32 1.442695, %v718_v18  ;;  %770 = vadd.xlane.f32.xlu1 %v1831_v50 }
 0x292   :  { %1204 = vpow2.f32 %v750_v35  ;;  %768 = vadd.xlane.f32.xlu0 %v1833_v19 }
 0x293   :  { %1206 = vpow2.f32 %v748_v54 }
 0x294   :  { %v1837_v63 = vpop.eup %1196 }
 0x295   :  { %v1839_v11 = vpop.eup %1198  ;;  %774 = vadd.xlane.f32.xlu1 %v1837_v63 }
 0x296   :  { %772 = vadd.xlane.f32.xlu0 %v1839_v11 }
 0x298   :  { %v1843_v14 = vpop.eup %1200 }
 0x299   :  { %v1845_v24 = vpop.eup %1202  ;;  %778 = vadd.xlane.f32.xlu1 %v1843_v14 }
 0x29a   :  { %776 = vadd.xlane.f32.xlu0 %v1845_v24 }
 0x29c   :  { %v1849_v31 = vpop.eup %1204 }
 0x29d   :  { %v1851_v32 = vpop.eup %1206  ;;  %782 = vadd.xlane.f32.xlu1 %v1849_v31 }
 0x29e   :  { %780 = vadd.xlane.f32.xlu0 %v1851_v32 }
 0x2cc   :  { %v434_v58 = vpop.xlane.xlu1 %433 }
 0x2cd   :  { %1208 = vrcp.f32 %v434_v58  ;;  %v432_v25 = vpop.xlane.xlu0 %431 }
 0x2ce   :  { %1210 = vrcp.f32 %v432_v25 }
 0x2d0   :  { %v438_v2 = vpop.xlane.xlu1 %437 }
 0x2d1   :  { %1212 = vrcp.f32 %v438_v2  ;;  %v436_v38 = vpop.xlane.xlu0 %435 }
 0x2d2   :  { %1214 = vrcp.f32 %v436_v38 }
 0x2d4   :  { %v442_v60 = vpop.xlane.xlu1 %441 }
 0x2d5   :  { %1216 = vrcp.f32 %v442_v60  ;;  %v440_v39 = vpop.xlane.xlu0 %439 }
 0x2d6   :  { %1218 = vrcp.f32 %v440_v39 }
 0x2d7   :  { %v1209_v36 = vpop.eup %1208 }
 0x2d8   :  { %v1211_v43 = vpop.eup %1210  ;;  %v480_v34 = vmul.f32 %v1209_v36, %v1735_v37  ;;  %v446_v46 = vpop.xlane.xlu1 %445 }
 0x2d9   :  { %v479_v10 = vmul.f32 %v1211_v43, %v1737_v42  ;;  %1220 = vrcp.f32 %v446_v46  ;;  %v444_v52 = vpop.xlane.xlu0 %443 }
 0x2da   :  { %496 = vst [vmem:[#allocation7 + $0x8] sm:$0xff] %v480_v34  ;;  %1222 = vrcp.f32 %v444_v52 }
 0x2db   :  { %v1213_v55 = vpop.eup %1212  ;;  %495 = vst [vmem:[#allocation7] sm:$0xff] %v479_v10 }
 0x2dc   :  { %v1215_v51 = vpop.eup %1214  ;;  %v482_v53 = vmul.f32 %v1213_v55, %v1743_v49  ;;  %v450_v1 = vpop.xlane.xlu1 %449 }
 0x2dd   :  { %v481_v57 = vmul.f32 %v1215_v51, %v1745_v56  ;;  %1224 = vrcp.f32 %v450_v1  ;;  %v448_v16 = vpop.xlane.xlu0 %447 }
 0x2de   :  { %498 = vst [vmem:[#allocation7 + $0x18] sm:$0xff] %v482_v53  ;;  %1226 = vrcp.f32 %v448_v16 }
 0x2df   :  { %v1217_v37 = vpop.eup %1216  ;;  %497 = vst [vmem:[#allocation7 + $0x10] sm:$0xff] %v481_v57 }
 0x2e0   :  { %v1219_v0 = vpop.eup %1218  ;;  %v484_v42 = vmul.f32 %v1217_v37, %v1751_v30  ;;  %v454_v7 = vpop.xlane.xlu1 %453 }
 0x2e1   :  { %v483_v20 = vmul.f32 %v1219_v0, %v1753_v62  ;;  %1228 = vrcp.f32 %v454_v7  ;;  %v452_v21 = vpop.xlane.xlu0 %451 }
 0x2e2   :  { %500 = vst [vmem:[#allocation7 + $0x28] sm:$0xff] %v484_v42  ;;  %1230 = vrcp.f32 %v452_v21 }
 0x2e3   :  { %v1221_v49 = vpop.eup %1220  ;;  %499 = vst [vmem:[#allocation7 + $0x20] sm:$0xff] %v483_v20 }
 0x2e4   :  { %v1223_v59 = vpop.eup %1222  ;;  %v486_v56 = vmul.f32 %v1221_v49, %v1759_v45  ;;  %v458_v27 = vpop.xlane.xlu1 %457 }
 0x2e5   :  { %v485_v29 = vmul.f32 %v1223_v59, %v1761_v47  ;;  %1232 = vrcp.f32 %v458_v27  ;;  %v456_v44 = vpop.xlane.xlu0 %455 }
 0x2e6   :  { %502 = vst [vmem:[#allocation7 + $0x38] sm:$0xff] %v486_v56  ;;  %1234 = vrcp.f32 %v456_v44 }
 0x2e7   :  { %v1225_v30 = vpop.eup %1224  ;;  %501 = vst [vmem:[#allocation7 + $0x30] sm:$0xff] %v485_v29 }
 0x2e8   :  { %v1227_v9 = vpop.eup %1226  ;;  %v488_v62 = vmul.f32 %v1225_v30, %v1767_v13  ;;  %v462_v48 = vpop.xlane.xlu1 %461 }
 0x2e9   :  { %v487_v61 = vmul.f32 %v1227_v9, %v1769_v6  ;;  %1236 = vrcp.f32 %v462_v48  ;;  %v460_v18 = vpop.xlane.xlu0 %459 }
 0x2ea   :  { %504 = vst [vmem:[#allocation7 + $0x48] sm:$0xff] %v488_v62  ;;  %1238 = vrcp.f32 %v460_v18 }
 0x2eb   :  { %v1229_v45 = vpop.eup %1228  ;;  %503 = vst [vmem:[#allocation7 + $0x40] sm:$0xff] %v487_v61 }
 0x2ec   :  { %v1231_v35 = vpop.eup %1230  ;;  %v490_v47 = vmul.f32 %v1229_v45, %v1773_v12 }
 0x2ed   :  { %v489_v54 = vmul.f32 %v1231_v35, %v1775_v8 }
 0x2ee   :  { %506 = vst [vmem:[#allocation7 + $0x58] sm:$0xff] %v490_v47 }
 0x2ef   :  { %v1233_v58 = vpop.eup %1232  ;;  %505 = vst [vmem:[#allocation7 + $0x50] sm:$0xff] %v489_v54 }
 0x2f0   :  { %v1235_v25 = vpop.eup %1234  ;;  %v492_v13 = vmul.f32 %v1233_v58, %v1779_v26 }
 0x2f1   :  { %v491_v2 = vmul.f32 %v1235_v25, %v1781_v15 }
 0x2f2   :  { %508 = vst [vmem:[#allocation7 + $0x68] sm:$0xff] %v492_v13 }
 0x2f3   :  { %v1237_v6 = vpop.eup %1236  ;;  %507 = vst [vmem:[#allocation7 + $0x60] sm:$0xff] %v491_v2 }
 0x2f4   :  { %v1239_v38 = vpop.eup %1238  ;;  %v494_v60 = vmul.f32 %v1237_v6, %v1785_v23 }
 0x2f5   :  { %v493_v12 = vmul.f32 %v1239_v38, %v1787_v33 }
 0x2f6   :  { %510 = vst [vmem:[#allocation7 + $0x78] sm:$0xff] %v494_v60 }
 0x2f7   :  { %509 = vst [vmem:[#allocation7 + $0x70] sm:$0xff] %v493_v12 }
 0x2f8   :  { %1327 = shalt.err (!%p1324_p6)
}
 0x2f9   :  { %s1328_s14 = scalar_lea.hbm %s1919_s2, 2048 }
 0x2fa   :  { %p1329_p7 = scmp.ne.s32.totalorder %s1919_s2, %s1328_s14  ;;  %p1332_p8 = scmp.lt.u32.totalorder %s1328_s14, %s1919_s2 }
 0x2fc   :  { %p1334_p9 = pnand %p1332_p8, %p1329_p7 }
 0x2fe   :  { %1337 = shalt.err (!%p1334_p9)
}
 0x2ff   :  { %843 = dma.vmem_to_hbm [thread:$0]  %s838_s10, 2048, %s1919_s2, [#allocation4], %s1369_s22, %s1369_s22, %s1370_s23  }
 0x300   :  { %s1373_s2 = smov [#allocation8]  }
 0x301   :  { %s849_s21 = sshll.u32 %s1373_s2, 4  ;;  %s850_s21 = int_to_ptr.vmem [resolvable:$true] %s849_s21 }
 0x302   :  { %s1338_s24 = scalar_lea.vmem %s850_s21, 2048  ;;  %p1343_p11 = scmp.lt.s32.totalorder %s850_s21, %s850_s21 }
 0x303   :  { %p1339_p10 = scmp.ne.s32.totalorder %s850_s21, %s1338_s24  ;;  %p1344_p12 = scmp.lt.s32.totalorder %s1338_s24, %s1338_s24 }
 0x305   :  { %p1345_p13 = por %p1344_p12, %p1343_p11 }
 0x307   :  { %p1346_p0 = pnand %p1345_p13, %p1339_p10 }
 0x30e   :  { %v755_v8 = vpop.xlane.xlu1 %754 }
 0x30f   :  { %1240 = vrcp.f32 %v755_v8  ;;  %v753_v26 = vpop.xlane.xlu0 %752 }
 0x310   :  { %1242 = vrcp.f32 %v753_v26 }
 0x312   :  { %v759_v15 = vpop.xlane.xlu1 %758 }
 0x313   :  { %1244 = vrcp.f32 %v759_v15  ;;  %v757_v23 = vpop.xlane.xlu0 %756 }
 0x314   :  { %1246 = vrcp.f32 %v757_v23 }
 0x316   :  { %v763_v33 = vpop.xlane.xlu1 %762 }
 0x317   :  { %1248 = vrcp.f32 %v763_v33  ;;  %v761_v39 = vpop.xlane.xlu0 %760 }
 0x318   :  { %1250 = vrcp.f32 %v761_v39 }
 0x319   :  { %v1241_v36 = vpop.eup %1240 }
 0x31a   :  { %v1243_v43 = vpop.eup %1242  ;;  %v801_v34 = vmul.f32 %v1241_v36, %v1799_v4  ;;  %v767_v46 = vpop.xlane.xlu1 %766 }
 0x31b   :  { %v800_v10 = vmul.f32 %v1243_v43, %v1801_v22  ;;  %1252 = vrcp.f32 %v767_v46  ;;  %v765_v52 = vpop.xlane.xlu0 %764 }
 0x31c   :  { %817 = vst [vmem:[#allocation8 + $0x8] sm:$0xff] %v801_v34  ;;  %1254 = vrcp.f32 %v765_v52 }
 0x31d   :  { %v1245_v55 = vpop.eup %1244  ;;  %816 = vst [vmem:[#allocation8] sm:$0xff] %v800_v10 }
 0x31e   :  { %v1247_v51 = vpop.eup %1246  ;;  %v803_v53 = vmul.f32 %v1245_v55, %v1807_v40  ;;  %v771_v1 = vpop.xlane.xlu1 %770 }
 0x31f   :  { %v802_v57 = vmul.f32 %v1247_v51, %v1809_v5  ;;  %1256 = vrcp.f32 %v771_v1  ;;  %v769_v16 = vpop.xlane.xlu0 %768 }
 0x320   :  { %819 = vst [vmem:[#allocation8 + $0x18] sm:$0xff] %v803_v53  ;;  %1258 = vrcp.f32 %v769_v16 }
 0x321   :  { %v1249_v4 = vpop.eup %1248  ;;  %818 = vst [vmem:[#allocation8 + $0x10] sm:$0xff] %v802_v57 }
 0x322   :  { %v1251_v37 = vpop.eup %1250  ;;  %v805_v22 = vmul.f32 %v1249_v4, %v1815_v3  ;;  %v775_v0 = vpop.xlane.xlu1 %774 }
 0x323   :  { %v804_v42 = vmul.f32 %v1251_v37, %v1817_v17  ;;  %1260 = vrcp.f32 %v775_v0  ;;  %v773_v7 = vpop.xlane.xlu0 %772 }
 0x324   :  { %821 = vst [vmem:[#allocation8 + $0x28] sm:$0xff] %v805_v22  ;;  %1262 = vrcp.f32 %v773_v7 }
 0x325   :  { %v1253_v40 = vpop.eup %1252  ;;  %820 = vst [vmem:[#allocation8 + $0x20] sm:$0xff] %v804_v42 }
 0x326   :  { %v1255_v20 = vpop.eup %1254  ;;  %v807_v5 = vmul.f32 %v1253_v40, %v1823_v41  ;;  %v779_v21 = vpop.xlane.xlu1 %778 }
 0x327   :  { %v806_v49 = vmul.f32 %v1255_v20, %v1825_v28  ;;  %1264 = vrcp.f32 %v779_v21  ;;  %v777_v59 = vpop.xlane.xlu0 %776 }
 0x328   :  { %823 = vst [vmem:[#allocation8 + $0x38] sm:$0xff] %v807_v5  ;;  %1266 = vrcp.f32 %v777_v59 }
 0x329   :  { %v1257_v3 = vpop.eup %1256  ;;  %822 = vst [vmem:[#allocation8 + $0x30] sm:$0xff] %v806_v49 }
 0x32a   :  { %v1259_v56 = vpop.eup %1258  ;;  %v809_v17 = vmul.f32 %v1257_v3, %v1831_v50  ;;  %v783_v27 = vpop.xlane.xlu1 %782 }
 0x32b   :  { %v808_v29 = vmul.f32 %v1259_v56, %v1833_v19  ;;  %1268 = vrcp.f32 %v783_v27  ;;  %v781_v44 = vpop.xlane.xlu0 %780 }
 0x32c   :  { %825 = vst [vmem:[#allocation8 + $0x48] sm:$0xff] %v809_v17  ;;  %1270 = vrcp.f32 %v781_v44 }
 0x32d   :  { %v1261_v41 = vpop.eup %1260  ;;  %824 = vst [vmem:[#allocation8 + $0x40] sm:$0xff] %v808_v29 }
 0x32e   :  { %v1263_v30 = vpop.eup %1262  ;;  %v811_v28 = vmul.f32 %v1261_v41, %v1837_v63 }
 0x32f   :  { %v810_v9 = vmul.f32 %v1263_v30, %v1839_v11 }
 0x330   :  { %827 = vst [vmem:[#allocation8 + $0x58] sm:$0xff] %v811_v28 }
 0x331   :  { %v1265_v62 = vpop.eup %1264  ;;  %826 = vst [vmem:[#allocation8 + $0x50] sm:$0xff] %v810_v9 }
 0x332   :  { %v1267_v48 = vpop.eup %1266  ;;  %v813_v50 = vmul.f32 %v1265_v62, %v1843_v14 }
 0x333   :  { %v812_v61 = vmul.f32 %v1267_v48, %v1845_v24 }
 0x334   :  { %829 = vst [vmem:[#allocation8 + $0x68] sm:$0xff] %v813_v50 }
 0x335   :  { %v1269_v19 = vpop.eup %1268  ;;  %828 = vst [vmem:[#allocation8 + $0x60] sm:$0xff] %v812_v61 }
 0x336   :  { %v1271_v18 = vpop.eup %1270  ;;  %v815_v45 = vmul.f32 %v1269_v19, %v1849_v31 }
 0x337   :  { %v814_v63 = vmul.f32 %v1271_v18, %v1851_v32 }
 0x338   :  { %831 = vst [vmem:[#allocation8 + $0x78] sm:$0xff] %v815_v45 }
 0x339   :  { %830 = vst [vmem:[#allocation8 + $0x70] sm:$0xff] %v814_v63 }
 0x33a   :  { %1349 = shalt.err (!%p1346_p0)
}
 0x33b   :  { %s1350_s27 = scalar_lea.hbm %s1920_s3, 2048 }
 0x33c   :  { %p1351_p1 = scmp.ne.s32.totalorder %s1920_s3, %s1350_s27  ;;  %p1354_p2 = scmp.lt.u32.totalorder %s1350_s27, %s1920_s3 }
 0x33e   :  { %p1356_p3 = pnand %p1354_p2, %p1351_p1 }
 0x340   :  { %1359 = shalt.err (!%p1356_p3)
}
 0x341   :  { %855 = dma.vmem_to_hbm [thread:$0]  %s850_s21, 2048, %s1920_s3, [#allocation9], %s1369_s22, %s1369_s22, %s1370_s23  }
 0x342   :  { %1364 = dma.done.wait [#allocation4], 2048  }
 0x343   :  { %1365 = vsyncadd [#allocation4], 4294965248 }
 0x344   :  { %1366 = dma.done.wait [#allocation9], 2048  }
 0x345   :  { %1367 = vsyncadd [#allocation9], 4294965248 }
 0x346   :  { %862 = vsyncpa [#allocation3], 1 }
 0x347   :  { %863 = vsyncpa [#allocation6], 1 }
 0x348   :  { %864 = vsyncpa [#allocation4], 1 }
 0x349   :  { %865 = vsyncpa [#allocation9], 1 }

</bundles_post_ra>
